<compile_context>
chip_gen: v6e
topology: v6e:2x2x1
jax: 0.10.0
libtpu: 0.0.40
codegen_flags: <defaults>
</compile_context>

<pallas_src>
import math
from functools import partial

import jax
import jax.numpy as jnp
from jax import lax
from jax.experimental import pallas as pl
from jax.experimental.pallas import tpu as pltpu


# ----------------------------------------------------------------------------
# Hardware-aware knobs
# ----------------------------------------------------------------------------
_VMEM_LIMIT_CACHE = None


def _vmem_limit_bytes():
    """~37% of physical VMEM: leaves pipelining / XLA-fusion headroom on every
    generation (v5e/v6e: 128 MiB -> 48 MiB; v7x: 64 MiB per TC -> 24 MiB)."""
    global _VMEM_LIMIT_CACHE
    if _VMEM_LIMIT_CACHE is None:
        cap = 128 * 1024 * 1024
        try:
            cap = int(pltpu.get_tpu_info().vmem_capacity_bytes)
        except Exception:
            pass
        _VMEM_LIMIT_CACHE = (cap * 3) // 8
    return _VMEM_LIMIT_CACHE


def _sublane_align(dtype):
    """Sublane alignment of the second-minor tile dim: 8 f32, 16 bf16, 32 i8."""
    return max(8, 32 // jnp.dtype(dtype).itemsize)


def _pick_tile(dim, pref, align):
    """Largest tile <= pref that divides `dim` and is a multiple of `align`;
    falls back to the full dim (a full-extent block is always legal)."""
    if dim <= pref:
        return dim
    t = (min(pref, dim) // align) * align
    while t >= align:
        if dim % t == 0:
            return t
        t -= align
    # TODO(synk): replace the full-extent fallback with a cdiv grid + masked
    # epilogue so awkward (prime-ish) dims stay VMEM-bounded on v7x.
    return dim


# ----------------------------------------------------------------------------
# Tiled, pipelined linear:  y = x @ w   with w pre-transposed to [K, N]
# ----------------------------------------------------------------------------
def _linear_kernel(x_ref, w_ref, o_ref, acc_ref):
    # x_ref: [tm, tk], w_ref: [tk, tn] (pre-transposed at init), o_ref: [tm, tn]
    @pl.when(pl.program_id(2) == 0)
    def _():
        acc_ref[...] = jnp.zeros(acc_ref.shape, acc_ref.dtype)

    # Operands stay in storage dtype (bf16 in compute_dtype mode); f32 accum.
    acc_ref[...] += jnp.dot(x_ref[...], w_ref[...],
                            preferred_element_type=jnp.float32)

    @pl.when(pl.program_id(2) == pl.num_programs(2) - 1)
    def _():
        o_ref[...] = acc_ref[...].astype(o_ref.dtype)


def pallas_linear(x, w_t, *, tm_pref=256, tn_pref=256, tk_pref=512, out_dtype=None):
    """x: [..., K], w_t: [K, N] (weight already transposed at init) -> [..., N]."""
    lead = x.shape[:-1]
    K = x.shape[-1]
    N = w_t.shape[1]
    assert w_t.shape[0] == K, (w_t.shape, K)
    x2 = x.reshape(-1, K)
    M = x2.shape[0]
    out_dtype = out_dtype or x.dtype

    tm = _pick_tile(M, tm_pref, _sublane_align(x.dtype))   # sublane-aligned (or full)
    tn = _pick_tile(N, tn_pref, 128)                       # lane-aligned (or full)
    tk = _pick_tile(K, tk_pref, 128)                       # lane-aligned (or full)

    grid = (M // tm, N // tn, K // tk)
    # NOTE: on v7x both TensorCores are used when the parallel axes have >= 2
    # blocks; at tiny M/N the grid degenerates to (1,1,1) and one core idles.
    out = pl.pallas_call(
        _linear_kernel,
        out_shape=jax.ShapeDtypeStruct((M, N), out_dtype),
        grid=grid,
        in_specs=[
            pl.BlockSpec((tm, tk), lambda i, j, k: (i, k)),
            pl.BlockSpec((tk, tn), lambda i, j, k: (k, j)),
        ],
        out_specs=pl.BlockSpec((tm, tn), lambda i, j, k: (i, j)),
        scratch_shapes=[pltpu.VMEM((tm, tn), jnp.float32)],
        compiler_params=pltpu.CompilerParams(
            dimension_semantics=("parallel", "parallel", "arbitrary"),
            vmem_limit_bytes=_vmem_limit_bytes(),
        ),
    )(x2, w_t)
    return out.reshape(*lead, N)


# ----------------------------------------------------------------------------
# Flash-style attention over the KV axis (online softmax), all heads per step.
#   Inputs in natural [B, T, heads*D] layout; k_rope shared across heads.
#   Output written lane-dense as [B, T, nH*d_v] (what out_proj consumes).
# ----------------------------------------------------------------------------
def _mla_attn_kernel(qn_ref, qr_ref, kn_ref, kr_ref, v_ref, o_ref,
                     m_ref, l_ref, acc_ref, *, scale, num_heads,
                     d_nope, d_rope, d_v):
    # qn_ref: [tq, nH*d_nope], qr_ref: [tq, nH*d_rope]
    # kn_ref: [tkv, nH*d_nope], kr_ref: [tkv, d_rope] (shared across heads)
    # v_ref : [tkv, nH*d_v],   o_ref: [tq, nH*d_v]
    kv_i = pl.program_id(2)

    @pl.when(kv_i == 0)
    def _init():
        m_ref[...] = jnp.full(m_ref.shape, -jnp.inf, dtype=m_ref.dtype)
        l_ref[...] = jnp.zeros(l_ref.shape, l_ref.dtype)
        acc_ref[...] = jnp.zeros(acc_ref.shape, acc_ref.dtype)

    k_rope = kr_ref[...]                       # storage dtype, shared by all heads
    # Static unroll over heads (small for this module).
    # TODO(synk): for large num_heads, move heads onto a grid axis with a
    # head-group size chosen so the output slab stays a multiple of 128 lanes.
    for h in range(num_heads):
        sl_n = slice(h * d_nope, (h + 1) * d_nope)
        sl_r = slice(h * d_rope, (h + 1) * d_rope)
        sl_v = slice(h * d_v, (h + 1) * d_v)

        # Softmax scale folded into the (small) q tiles; operands stay in
        # storage dtype (bf16 in compute_dtype mode) -> native MXU passes.
        qn = qn_ref[:, sl_n] * scale
        qr = qr_ref[:, sl_r] * scale
        kn = kn_ref[:, sl_n]
        # scores = qn @ kn^T + qr @ k_rope^T (contract last dims; no transpose,
        # no materialized concat of nope|rope, no broadcast of k_rope).
        s = lax.dot_general(qn, kn,
                            dimension_numbers=(((1,), (1,)), ((), ())),
                            preferred_element_type=jnp.float32)
        s = s + lax.dot_general(qr, k_rope,
                                dimension_numbers=(((1,), (1,)), ((), ())),
                                preferred_element_type=jnp.float32)
        # TODO(synk): attention_mask addition and attn_dropout (eval ->
        # identity) are not applied inside the kernel.
        # TODO(synk): the reference's F.softmax(dim=-1) on a [b,t,s,h] score
        # tensor literally normalizes over heads; standard key-axis softmax is
        # implemented here (assumed intent of the module).

        m_prev = m_ref[h]                                        # [tq, 1]
        m_new = jnp.maximum(m_prev, jnp.max(s, axis=-1, keepdims=True))
        alpha = jnp.exp(m_prev - m_new)
        p = jnp.exp(s - m_new)                                   # f32
        l_ref[h] = alpha * l_ref[h] + jnp.sum(p, axis=-1, keepdims=True)
        v_h = v_ref[:, sl_v]
        acc_ref[:, sl_v] = alpha * acc_ref[:, sl_v] + jnp.dot(
            p.astype(v_h.dtype), v_h, preferred_element_type=jnp.float32)
        m_ref[h] = m_new

    @pl.when(kv_i == pl.num_programs(2) - 1)
    def _finalize():
        for h in range(num_heads):
            inv_l = pl.reciprocal(l_ref[h], approx=False)        # exact division
            acc_ref[:, h * d_v:(h + 1) * d_v] = acc_ref[:, h * d_v:(h + 1) * d_v] * inv_l
        # Single lane-dense store (last dim = nH*d_v), no per-head masked vst.
        o_ref[...] = acc_ref[...].astype(o_ref.dtype)


def pallas_attention(q_nope, q_rope, k_nope, k_rope, v, scale, *,
                     num_heads, d_nope, d_rope, d_v, tq_pref=256, tkv_pref=512):
    """q_nope: [B,T,nH*d_nope], q_rope: [B,T,nH*d_rope], k_nope: [B,S,nH*d_nope],
    k_rope: [B,S,d_rope] (shared across heads), v: [B,S,nH*d_v]
    -> [B, T, nH*d_v] (head-major, ready for out_proj; no transposes)."""
    B, T, _ = q_nope.shape
    S = k_nope.shape[1]
    tq = _pick_tile(T, tq_pref, _sublane_align(q_nope.dtype))
    tkv = _pick_tile(S, tkv_pref, 128)   # lane dim of the score matrix -> 128-aligned
    grid = (B, T // tq, S // tkv)

    kern = partial(_mla_attn_kernel, scale=scale, num_heads=num_heads,
                   d_nope=d_nope, d_rope=d_rope, d_v=d_v)
    return pl.pallas_call(
        kern,
        out_shape=jax.ShapeDtypeStruct((B, T, num_heads * d_v), q_nope.dtype),
        grid=grid,
        in_specs=[
            pl.BlockSpec((None, tq, num_heads * d_nope), lambda b, qi, kv: (b, qi, 0)),
            pl.BlockSpec((None, tq, num_heads * d_rope), lambda b, qi, kv: (b, qi, 0)),
            pl.BlockSpec((None, tkv, num_heads * d_nope), lambda b, qi, kv: (b, kv, 0)),
            pl.BlockSpec((None, tkv, d_rope), lambda b, qi, kv: (b, kv, 0)),
            pl.BlockSpec((None, tkv, num_heads * d_v), lambda b, qi, kv: (b, kv, 0)),
        ],
        out_specs=pl.BlockSpec((None, tq, num_heads * d_v),
                               lambda b, qi, kv: (b, qi, 0)),
        scratch_shapes=[
            pltpu.VMEM((num_heads, tq, 1), jnp.float32),     # running max m
            pltpu.VMEM((num_heads, tq, 1), jnp.float32),     # running denom l
            pltpu.VMEM((tq, num_heads * d_v), jnp.float32),  # running numerator
        ],
        compiler_params=pltpu.CompilerParams(
            dimension_semantics=("parallel", "parallel", "arbitrary"),
            vmem_limit_bytes=_vmem_limit_bytes(),
        ),
    )(q_nope, q_rope, k_nope, k_rope, v)


# ----------------------------------------------------------------------------
# Plain-JAX glue
# ----------------------------------------------------------------------------
def layer_norm(x, weight, bias, eps=1e-5):
    x32 = x.astype(jnp.float32)
    mean = jnp.mean(x32, axis=-1, keepdims=True)
    var = jnp.mean((x32 - mean) ** 2, axis=-1, keepdims=True)
    y = (x32 - mean) / jnp.sqrt(var + eps)
    y = y * weight.astype(jnp.float32) + bias.astype(jnp.float32)
    return y.astype(x.dtype)


def apply_rotary_emb(x, freqs_cis, position_ids):
    """x: [B, T, H, D] (D even), freqs_cis: complex64 [max_len, D//2],
    position_ids: [B, T] int32.
    # TODO(synk): apply_rotary_emb is not defined in the reference module;
    # standard LLaMA-style complex-pair rotary is assumed (NeoX rotate-half
    # layout would differ)."""
    B, T, H, D = x.shape
    fc = freqs_cis[position_ids]                     # [B, T, D//2] complex
    cos = jnp.real(fc)[:, :, None, :]
    sin = jnp.imag(fc)[:, :, None, :]
    xr = x.astype(jnp.float32).reshape(B, T, H, D // 2, 2)
    x0, x1 = xr[..., 0], xr[..., 1]
    o0 = x0 * cos - x1 * sin
    o1 = x0 * sin + x1 * cos
    return jnp.stack([o0, o1], axis=-1).reshape(B, T, H, D).astype(x.dtype)


def xavier_uniform(key, out_f, in_f, gain=1.0, dtype=jnp.float32):
    limit = gain * math.sqrt(6.0 / (in_f + out_f))
    return jax.random.uniform(key, (out_f, in_f), dtype=dtype, minval=-limit, maxval=limit)


def prepare_params(torch_params, cfg):
    """One-time layout plumbing from torch-layout ([out, in]) weights:
      * transpose to [in, out] -> MXU-preferred ((1,),(0,)) contraction,
      * fuse q_proj + kv_proj_a (single pass over hidden_states),
      * permute output columns so q_nope|q_rope and k_nope|v come out as
        contiguous head-major slabs -> attention runs with zero host-side
        transposes / concats / broadcasts."""
    nH = cfg["num_heads"]
    d_nope, d_rope = cfg["qk_nope_head_dim"], cfg["qk_rope_head_dim"]
    d_qk = d_nope + d_rope
    d_v = cfg["v_head_dim"]

    wq = torch_params["q_proj"]                        # [nH*d_qk, hidden]
    rows = jnp.arange(nH * d_qk).reshape(nH, d_qk)
    q_perm = jnp.concatenate([rows[:, :d_nope].reshape(-1),
                              rows[:, d_nope:].reshape(-1)])
    w_qkv_a = jnp.concatenate([wq[q_perm], torch_params["kv_proj_a"]], axis=0)

    wkvb = torch_params["kv_proj_b"]                   # [nH*(d_nope+d_v), kv_rank]
    rows = jnp.arange(nH * (d_nope + d_v)).reshape(nH, d_nope + d_v)
    kv_perm = jnp.concatenate([rows[:, :d_nope].reshape(-1),
                               rows[:, d_nope:].reshape(-1)])

    return {
        "qkv_a_t": w_qkv_a.T,                 # [hidden, nH*d_qk + kv_rank + d_rope]
        "kv_b_t": wkvb[kv_perm].T,            # [kv_rank, nH*d_nope + nH*d_v]
        "out_t": torch_params["out_proj"].T,  # [nH*d_v, hidden]
        "kv_norm_w": torch_params["kv_norm_w"],
        "kv_norm_b": torch_params["kv_norm_b"],
    }


# ----------------------------------------------------------------------------
# MultiLatentAttention forward (q_lora_rank == 0 path, no KV cache, no mask)
# ----------------------------------------------------------------------------
def mla_forward(params, cfg, hidden_states, freqs_cis, position_ids=None,
                attention_mask=None, compute_dtype=None):
    # TODO(synk): attention_mask / past_key_value / use_cache / output_attentions
    # branches are not exercised (inference, no cache, no mask).
    # TODO(synk): MLA weight-absorption (folding kv_proj_b into q/out) would
    # shrink attended K/V to the latent dim for decode; not applied here.
    if compute_dtype is not None:
        hidden_states = hidden_states.astype(compute_dtype)
        params = {k: (v.astype(compute_dtype) if v.ndim == 2 else v)
                  for k, v in params.items()}

    B, T, _ = hidden_states.shape
    nH = cfg["num_heads"]
    d_nope, d_rope = cfg["qk_nope_head_dim"], cfg["qk_rope_head_dim"]
    d_qk = d_nope + d_rope
    d_v = cfg["v_head_dim"]
    kv_rank = cfg["kv_lora_rank"]
    scale = d_qk ** (-0.5) * cfg["attention_scale_factor"]

    max_len = freqs_cis.shape[0]
    if position_ids is None:
        position_ids = jnp.broadcast_to(jnp.arange(T) % max_len, (B, T))
    else:
        position_ids = position_ids % max_len   # matches reference behavior

    # --- fused Q + KV-A projection (single pass over hidden_states) ---
    fused = pallas_linear(hidden_states, params["qkv_a_t"])
    n_qn, n_qr = nH * d_nope, nH * d_rope
    q_nope = fused[..., :n_qn]                                  # [B,T,nH*d_nope]
    q_rope = fused[..., n_qn:n_qn + n_qr]                       # [B,T,nH*d_rope]
    kv_latent = fused[..., n_qn + n_qr:n_qn + n_qr + kv_rank]   # [B,T,kv_rank]
    k_rope = fused[..., n_qn + n_qr + kv_rank:]                 # [B,T,d_rope]

    # --- rotary (plain-JAX elementwise glue) ---
    q_rope = apply_rotary_emb(q_rope.reshape(B, T, nH, d_rope),
                              freqs_cis, position_ids).reshape(B, T, nH * d_rope)
    k_rope = apply_rotary_emb(k_rope[:, :, None, :], freqs_cis, position_ids)[:, :, 0, :]

    # --- KV latent up-projection (columns already permuted: k_nope | v) ---
    kv_latent = layer_norm(kv_latent, params["kv_norm_w"], params["kv_norm_b"])
    kv_up = pallas_linear(kv_latent, params["kv_b_t"])
    k_nope = kv_up[..., :nH * d_nope]                           # [B,T,nH*d_nope]
    v = kv_up[..., nH * d_nope:]                                # [B,T,nH*d_v]

    # --- flash-style attention, no host transposes / concats / broadcasts ---
    attn = pallas_attention(q_nope, q_rope, k_nope, k_rope, v, scale,
                            num_heads=nH, d_nope=d_nope, d_rope=d_rope, d_v=d_v)

    # --- output projection (attn already in [B, T, nH*d_v] head-major layout) ---
    return pallas_linear(attn, params["out_t"])


# ----------------------------------------------------------------------------
# Main
# ----------------------------------------------------------------------------
if __name__ == "__main__":
    cfg = dict(
        hidden_size=32,
        num_heads=2,
        qk_nope_head_dim=32,
        qk_rope_head_dim=32,
        v_head_dim=64,
        kv_lora_rank=32,
        attention_scale_factor=1.0,
    )
    H = cfg["hidden_size"]
    nH = cfg["num_heads"]
    d_qk = cfg["qk_nope_head_dim"] + cfg["qk_rope_head_dim"]
    d_v = cfg["v_head_dim"]
    kv_rank = cfg["kv_lora_rank"]
    d_rope = cfg["qk_rope_head_dim"]

    B, T, max_len = 2, 8, 16

    key = jax.random.PRNGKey(0)
    k1, k2, k3, k4, kx = jax.random.split(key, 5)
    torch_params = {
        "q_proj": xavier_uniform(k1, nH * d_qk, H),
        "kv_proj_a": xavier_uniform(k2, kv_rank + d_rope, H),
        "kv_proj_b": xavier_uniform(k3, nH * (cfg["qk_nope_head_dim"] + d_v), kv_rank),
        "out_proj": xavier_uniform(k4, H, nH * d_v, gain=1.0 / math.sqrt(2.0)),
        "kv_norm_w": jnp.ones((kv_rank,), jnp.float32),
        "kv_norm_b": jnp.zeros((kv_rank,), jnp.float32),
    }
    # One-time layout plumbing (transpose to [K,N], fuse q+kv_a, permute cols).
    params = prepare_params(torch_params, cfg)

    hidden_states = jax.random.normal(kx, (B, T, H), dtype=jnp.float32)

    # freqs_cis: complex rotary frequencies over qk_rope_head_dim // 2 pairs.
    inv_freq = 1.0 / (10000.0 ** (jnp.arange(0, d_rope, 2, dtype=jnp.float32) / d_rope))
    pos = jnp.arange(max_len, dtype=jnp.float32)
    angles = jnp.outer(pos, inv_freq)                     # [max_len, d_rope//2]
    freqs_cis = jnp.cos(angles) + 1j * jnp.sin(angles)    # complex64

    @jax.jit
    def run_f32(params, hidden_states, freqs_cis):
        return mla_forward(params, cfg, hidden_states, freqs_cis)

    @jax.jit
    def run_bf16(params, hidden_states, freqs_cis):
        # bf16 MXU-input mode (f32 accumulation preserved inside the kernels).
        return mla_forward(params, cfg, hidden_states, freqs_cis,
                           compute_dtype=jnp.bfloat16)

    out = jax.block_until_ready(run_f32(params, hidden_states, freqs_cis))
    assert out.shape == (B, T, H), out.shape
    assert jnp.isfinite(out).all()

    out_bf16 = jax.block_until_ready(run_bf16(params, hidden_states, freqs_cis))
    assert out_bf16.shape == (B, T, H), out_bf16.shape
    assert jnp.isfinite(out_bf16.astype(jnp.float32)).all()

    print("KERNEL_OK")
</pallas_src>

<mosaic_0001>
module attributes {stable_mosaic.version = 11 : i64} {
  func.func @_linear_kernel(%arg0: i32, %arg1: i32, %arg2: i32, %arg3: memref<16x32xf32, #tpu.memory_space<vmem>>, %arg4: memref<32x192xf32, #tpu.memory_space<vmem>>, %arg5: memref<16x192xf32, #tpu.memory_space<vmem>>, %arg6: memref<16x192xf32, #tpu.memory_space<vmem>>) attributes {dimension_semantics = [#tpu.dimension_semantics<parallel>, #tpu.dimension_semantics<parallel>, #tpu.dimension_semantics<arbitrary>], iteration_bounds = array<i64: 1, 1, 1>, scalar_prefetch = 0 : i64, scratch_operands = 1 : i64, tpu.core_type = #tpu.core_type<tc>, window_params = [{transform_indices = @transform_0, window_bounds = array<i64: 16, 32>}, {transform_indices = @transform_1, window_bounds = array<i64: 32, 192>}, {transform_indices = @transform_2, window_bounds = array<i64: 16, 192>}]} {
    %c0_i32 = arith.constant 0 : i32
    %0 = arith.cmpi eq, %arg2, %c0_i32 : i32
    %1 = arith.extui %0 : i1 to i32
    %c0_i32_0 = arith.constant 0 : i32
    %2 = arith.cmpi ne, %1, %c0_i32_0 : i32
    scf.if %2 {
      %cst_10 = arith.constant 0.000000e+00 : f32
      %12 = vector.broadcast %cst_10 : f32 to vector<16x192xf32>
      %c0_11 = arith.constant 0 : index
      %c0_12 = arith.constant 0 : index
      %13 = vector.load %arg6[%c0_11, %c0_12] : memref<16x192xf32, #tpu.memory_space<vmem>>, vector<16x192xf32>
      tpu.vector_store %arg6[%c0_11, %c0_12], %12 {strides = array<i32>} : memref<16x192xf32, #tpu.memory_space<vmem>>, vector<16x192xf32>,
    } else {
    }
    %c0 = arith.constant 0 : index
    %c0_1 = arith.constant 0 : index
    %3 = vector.load %arg6[%c0, %c0_1] : memref<16x192xf32, #tpu.memory_space<vmem>>, vector<16x192xf32>
    %c0_2 = arith.constant 0 : index
    %c0_3 = arith.constant 0 : index
    %4 = vector.load %arg3[%c0_2, %c0_3] : memref<16x32xf32, #tpu.memory_space<vmem>>, vector<16x32xf32>
    %c0_4 = arith.constant 0 : index
    %c0_5 = arith.constant 0 : index
    %5 = vector.load %arg4[%c0_4, %c0_5] : memref<32x192xf32, #tpu.memory_space<vmem>>, vector<32x192xf32>
    %cst = arith.constant dense<0.000000e+00> : vector<16x192xf32>
    %6 = tpu.matmul %4, %5, %cst {dimension_numbers = #tpu.dot_dimension_numbers<[1], [0], [0], [1], [0, 0, 1, 1], [], []>} : vector<16x32xf32>, vector<32x192xf32>, vector<16x192xf32> -> vector<16x192xf32>
    %7 = arith.addf %3, %6 : vector<16x192xf32>
    %c0_6 = arith.constant 0 : index
    %c0_7 = arith.constant 0 : index
    %8 = vector.load %arg6[%c0_6, %c0_7] : memref<16x192xf32, #tpu.memory_space<vmem>>, vector<16x192xf32>
    tpu.vector_store %arg6[%c0_6, %c0_7], %7 {strides = array<i32>} : memref<16x192xf32, #tpu.memory_space<vmem>>, vector<16x192xf32>,
    %c0_i32_8 = arith.constant 0 : i32
    %9 = arith.cmpi eq, %arg2, %c0_i32_8 : i32
    %10 = arith.extui %9 : i1 to i32
    %c0_i32_9 = arith.constant 0 : i32
    %11 = arith.cmpi ne, %10, %c0_i32_9 : i32
    scf.if %11 {
      %c0_10 = arith.constant 0 : index
      %c0_11 = arith.constant 0 : index
      %12 = vector.load %arg6[%c0_10, %c0_11] : memref<16x192xf32, #tpu.memory_space<vmem>>, vector<16x192xf32>
      %c0_12 = arith.constant 0 : index
      %c0_13 = arith.constant 0 : index
      %13 = vector.load %arg5[%c0_12, %c0_13] : memref<16x192xf32, #tpu.memory_space<vmem>>, vector<16x192xf32>
      tpu.vector_store %arg5[%c0_12, %c0_13], %12 {strides = array<i32>} : memref<16x192xf32, #tpu.memory_space<vmem>>, vector<16x192xf32>,
    } else {
    }
    return
  }
  func.func @transform_0(%arg0: i32, %arg1: i32, %arg2: i32) -> (i32, i32) {
    %c0_i32 = arith.constant 0 : i32
    return %arg0, %arg2 : i32, i32
  }
  func.func @transform_1(%arg0: i32, %arg1: i32, %arg2: i32) -> (i32, i32) {
    %c0_i32 = arith.constant 0 : i32
    return %arg2, %arg1 : i32, i32
  }
  func.func @transform_2(%arg0: i32, %arg1: i32, %arg2: i32) -> (i32, i32) {
    %c0_i32 = arith.constant 0 : i32
    return %arg0, %arg1 : i32, i32
  }
}

module attributes {stable_mosaic.version = 11 : i64} {
  func.func @_mla_attn_kernel(%arg0: i32, %arg1: i32, %arg2: i32, %arg3: memref<1x8x64xf32, #tpu.memory_space<vmem>>, %arg4: memref<1x8x64xf32, #tpu.memory_space<vmem>>, %arg5: memref<1x8x64xf32, #tpu.memory_space<vmem>>, %arg6: memref<1x8x32xf32, #tpu.memory_space<vmem>>, %arg7: memref<1x8x128xf32, #tpu.memory_space<vmem>>, %arg8: memref<1x8x128xf32, #tpu.memory_space<vmem>>, %arg9: memref<2x8x1xf32, #tpu.memory_space<vmem>>, %arg10: memref<2x8x1xf32, #tpu.memory_space<vmem>>, %arg11: memref<8x128xf32, #tpu.memory_space<vmem>>) attributes {dimension_semantics = [#tpu.dimension_semantics<parallel>, #tpu.dimension_semantics<parallel>, #tpu.dimension_semantics<arbitrary>], iteration_bounds = array<i64: 2, 1, 1>, scalar_prefetch = 0 : i64, scratch_operands = 3 : i64, tpu.core_type = #tpu.core_type<tc>, window_params = [{transform_indices = @transform_0, window_bounds = array<i64: 1, 8, 64>}, {transform_indices = @transform_1, window_bounds = array<i64: 1, 8, 64>}, {transform_indices = @transform_2, window_bounds = array<i64: 1, 8, 64>}, {transform_indices = @transform_3, window_bounds = array<i64: 1, 8, 32>}, {transform_indices = @transform_4, window_bounds = array<i64: 1, 8, 128>}, {transform_indices = @transform_5, window_bounds = array<i64: 1, 8, 128>}]} {
    %c0_i32 = arith.constant 0 : i32
    %0 = arith.cmpi eq, %arg2, %c0_i32 : i32
    %1 = arith.extui %0 : i1 to i32
    %c0_i32_0 = arith.constant 0 : i32
    %2 = arith.cmpi ne, %1, %c0_i32_0 : i32
    scf.if %2 {
      %cst_71 = arith.constant 0xFF800000 : f32
      %94 = vector.broadcast %cst_71 : f32 to vector<2x8x1xf32>
      %c0_72 = arith.constant 0 : index
      %c0_73 = arith.constant 0 : index
      %c0_74 = arith.constant 0 : index
      %95 = vector.load %arg9[%c0_72, %c0_73, %c0_74] : memref<2x8x1xf32, #tpu.memory_space<vmem>>, vector<2x8x1xf32>
      tpu.vector_store %arg9[%c0_72, %c0_73, %c0_74], %94 {strides = array<i32>} : memref<2x8x1xf32, #tpu.memory_space<vmem>>, vector<2x8x1xf32>,
      %cst_75 = arith.constant 0.000000e+00 : f32
      %96 = vector.broadcast %cst_75 : f32 to vector<2x8x1xf32>
      %c0_76 = arith.constant 0 : index
      %c0_77 = arith.constant 0 : index
      %c0_78 = arith.constant 0 : index
      %97 = vector.load %arg10[%c0_76, %c0_77, %c0_78] : memref<2x8x1xf32, #tpu.memory_space<vmem>>, vector<2x8x1xf32>
      tpu.vector_store %arg10[%c0_76, %c0_77, %c0_78], %96 {strides = array<i32>} : memref<2x8x1xf32, #tpu.memory_space<vmem>>, vector<2x8x1xf32>,
      %cst_79 = arith.constant 0.000000e+00 : f32
      %98 = vector.broadcast %cst_79 : f32 to vector<8x128xf32>
      %c0_80 = arith.constant 0 : index
      %c0_81 = arith.constant 0 : index
      %99 = vector.load %arg11[%c0_80, %c0_81] : memref<8x128xf32, #tpu.memory_space<vmem>>, vector<8x128xf32>
      tpu.vector_store %arg11[%c0_80, %c0_81], %98 {strides = array<i32>} : memref<8x128xf32, #tpu.memory_space<vmem>>, vector<8x128xf32>,
    } else {
    }
    %c0 = arith.constant 0 : index
    %c0_1 = arith.constant 0 : index
    %c0_2 = arith.constant 0 : index
    %3 = vector.load %arg6[%c0, %c0_1, %c0_2] : memref<1x8x32xf32, #tpu.memory_space<vmem>>, vector<1x8x32xf32>
    %4 = vector.shape_cast %3 : vector<1x8x32xf32> to vector<8x32xf32>
    %c0_3 = arith.constant 0 : index
    %c0_4 = arith.constant 0 : index
    %c0_5 = arith.constant 0 : index
    %5 = vector.load %arg3[%c0_3, %c0_4, %c0_5] : memref<1x8x64xf32, #tpu.memory_space<vmem>>, vector<1x8x32xf32>
    %6 = vector.shape_cast %5 : vector<1x8x32xf32> to vector<8x32xf32>
    %cst = arith.constant 1.250000e-01 : f32
    %7 = vector.broadcast %cst : f32 to vector<8x32xf32>
    %8 = arith.mulf %6, %7 : vector<8x32xf32>
    %c0_6 = arith.constant 0 : index
    %c0_7 = arith.constant 0 : index
    %c0_8 = arith.constant 0 : index
    %9 = vector.load %arg4[%c0_6, %c0_7, %c0_8] : memref<1x8x64xf32, #tpu.memory_space<vmem>>, vector<1x8x32xf32>
    %10 = vector.shape_cast %9 : vector<1x8x32xf32> to vector<8x32xf32>
    %cst_9 = arith.constant 1.250000e-01 : f32
    %11 = vector.broadcast %cst_9 : f32 to vector<8x32xf32>
    %12 = arith.mulf %10, %11 : vector<8x32xf32>
    %c0_10 = arith.constant 0 : index
    %c0_11 = arith.constant 0 : index
    %c0_12 = arith.constant 0 : index
    %13 = vector.load %arg5[%c0_10, %c0_11, %c0_12] : memref<1x8x64xf32, #tpu.memory_space<vmem>>, vector<1x8x32xf32>
    %14 = vector.shape_cast %13 : vector<1x8x32xf32> to vector<8x32xf32>
    %cst_13 = arith.constant dense<0.000000e+00> : vector<8x8xf32>
    %15 = tpu.matmul %8, %14, %cst_13 {dimension_numbers = #tpu.dot_dimension_numbers<[1], [1], [0], [0], [0, 0, 1, 0], [], []>} : vector<8x32xf32>, vector<8x32xf32>, vector<8x8xf32> -> vector<8x8xf32>
    %cst_14 = arith.constant dense<0.000000e+00> : vector<8x8xf32>
    %16 = tpu.matmul %12, %4, %cst_14 {dimension_numbers = #tpu.dot_dimension_numbers<[1], [1], [0], [0], [0, 0, 1, 0], [], []>} : vector<8x32xf32>, vector<8x32xf32>, vector<8x8xf32> -> vector<8x8xf32>
    %17 = arith.addf %15, %16 : vector<8x8xf32>
    %c0_15 = arith.constant 0 : index
    %c0_16 = arith.constant 0 : index
    %c0_17 = arith.constant 0 : index
    %18 = vector.load %arg9[%c0_15, %c0_16, %c0_17] : memref<2x8x1xf32, #tpu.memory_space<vmem>>, vector<1x8x1xf32>
    %19 = vector.shape_cast %18 : vector<1x8x1xf32> to vector<8x1xf32>
    %cst_18 = arith.constant dense<0xFF800000> : vector<8xf32>
    %20 = vector.multi_reduction <maximumf>, %17, %cst_18 [1] : vector<8x8xf32> to vector<8xf32>
    %21 = vector.shape_cast %20 : vector<8xf32> to vector<8x1xf32>
    %22 = arith.maximumf %19, %21 : vector<8x1xf32>
    %23 = arith.subf %19, %22 : vector<8x1xf32>
    %24 = math.exp %23 : vector<8x1xf32>
    %25 = vector.broadcast %22 : vector<8x1xf32> to vector<8x8xf32>
    %26 = arith.subf %17, %25 : vector<8x8xf32>
    %27 = math.exp %26 : vector<8x8xf32>
    %c0_19 = arith.constant 0 : index
    %c0_20 = arith.constant 0 : index
    %c0_21 = arith.constant 0 : index
    %28 = vector.load %arg10[%c0_19, %c0_20, %c0_21] : memref<2x8x1xf32, #tpu.memory_space<vmem>>, vector<1x8x1xf32>
    %29 = vector.shape_cast %28 : vector<1x8x1xf32> to vector<8x1xf32>
    %30 = arith.mulf %24, %29 : vector<8x1xf32>
    %cst_22 = arith.constant dense<0.000000e+00> : vector<8xf32>
    %31 = vector.multi_reduction <add>, %27, %cst_22 [1] : vector<8x8xf32> to vector<8xf32>
    %32 = vector.shape_cast %31 : vector<8xf32> to vector<8x1xf32>
    %33 = arith.addf %30, %32 : vector<8x1xf32>
    %c0_23 = arith.constant 0 : index
    %c0_24 = arith.constant 0 : index
    %c0_25 = arith.constant 0 : index
    %34 = vector.load %arg10[%c0_23, %c0_24, %c0_25] : memref<2x8x1xf32, #tpu.memory_space<vmem>>, vector<1x8x1xf32>
    %35 = vector.shape_cast %34 : vector<1x8x1xf32> to vector<8x1xf32>
    %36 = vector.shape_cast %33 : vector<8x1xf32> to vector<1x8x1xf32>
    tpu.vector_store %arg10[%c0_23, %c0_24, %c0_25], %36 {strides = array<i32>} : memref<2x8x1xf32, #tpu.memory_space<vmem>>, vector<1x8x1xf32>,
    %c0_26 = arith.constant 0 : index
    %c0_27 = arith.constant 0 : index
    %c0_28 = arith.constant 0 : index
    %37 = vector.load %arg7[%c0_26, %c0_27, %c0_28] : memref<1x8x128xf32, #tpu.memory_space<vmem>>, vector<1x8x64xf32>
    %38 = vector.shape_cast %37 : vector<1x8x64xf32> to vector<8x64xf32>
    %c0_29 = arith.constant 0 : index
    %c0_30 = arith.constant 0 : index
    %39 = vector.load %arg11[%c0_29, %c0_30] : memref<8x128xf32, #tpu.memory_space<vmem>>, vector<8x64xf32>
    %40 = vector.broadcast %24 : vector<8x1xf32> to vector<8x64xf32>
    %41 = arith.mulf %40, %39 : vector<8x64xf32>
    %cst_31 = arith.constant dense<0.000000e+00> : vector<8x64xf32>
    %42 = tpu.matmul %27, %38, %cst_31 {dimension_numbers = #tpu.dot_dimension_numbers<[1], [0], [0], [1], [0, 0, 1, 1], [], []>} : vector<8x8xf32>, vector<8x64xf32>, vector<8x64xf32> -> vector<8x64xf32>
    %43 = arith.addf %41, %42 : vector<8x64xf32>
    %c0_32 = arith.constant 0 : index
    %c0_33 = arith.constant 0 : index
    %44 = vector.load %arg11[%c0_32, %c0_33] : memref<8x128xf32, #tpu.memory_space<vmem>>, vector<8x64xf32>
    tpu.vector_store %arg11[%c0_32, %c0_33], %43 {strides = array<i32>} : memref<8x128xf32, #tpu.memory_space<vmem>>, vector<8x64xf32>,
    %c0_34 = arith.constant 0 : index
    %c0_35 = arith.constant 0 : index
    %c0_36 = arith.constant 0 : index
    %45 = vector.load %arg9[%c0_34, %c0_35, %c0_36] : memref<2x8x1xf32, #tpu.memory_space<vmem>>, vector<1x8x1xf32>
    %46 = vector.shape_cast %45 : vector<1x8x1xf32> to vector<8x1xf32>
    %47 = vector.shape_cast %22 : vector<8x1xf32> to vector<1x8x1xf32>
    tpu.vector_store %arg9[%c0_34, %c0_35, %c0_36], %47 {strides = array<i32>} : memref<2x8x1xf32, #tpu.memory_space<vmem>>, vector<1x8x1xf32>,
    %c0_37 = arith.constant 0 : index
    %c0_38 = arith.constant 0 : index
    %c32 = arith.constant 32 : index
    %48 = vector.load %arg3[%c0_37, %c0_38, %c32] : memref<1x8x64xf32, #tpu.memory_space<vmem>>, vector<1x8x32xf32>
    %49 = vector.shape_cast %48 : vector<1x8x32xf32> to vector<8x32xf32>
    %cst_39 = arith.constant 1.250000e-01 : f32
    %50 = vector.broadcast %cst_39 : f32 to vector<8x32xf32>
    %51 = arith.mulf %49, %50 : vector<8x32xf32>
    %c0_40 = arith.constant 0 : index
    %c0_41 = arith.constant 0 : index
    %c32_42 = arith.constant 32 : index
    %52 = vector.load %arg4[%c0_40, %c0_41, %c32_42] : memref<1x8x64xf32, #tpu.memory_space<vmem>>, vector<1x8x32xf32>
    %53 = vector.shape_cast %52 : vector<1x8x32xf32> to vector<8x32xf32>
    %cst_43 = arith.constant 1.250000e-01 : f32
    %54 = vector.broadcast %cst_43 : f32 to vector<8x32xf32>
    %55 = arith.mulf %53, %54 : vector<8x32xf32>
    %c0_44 = arith.constant 0 : index
    %c0_45 = arith.constant 0 : index
    %c32_46 = arith.constant 32 : index
    %56 = vector.load %arg5[%c0_44, %c0_45, %c32_46] : memref<1x8x64xf32, #tpu.memory_space<vmem>>, vector<1x8x32xf32>
    %57 = vector.shape_cast %56 : vector<1x8x32xf32> to vector<8x32xf32>
    %cst_47 = arith.constant dense<0.000000e+00> : vector<8x8xf32>
    %58 = tpu.matmul %51, %57, %cst_47 {dimension_numbers = #tpu.dot_dimension_numbers<[1], [1], [0], [0], [0, 0, 1, 0], [], []>} : vector<8x32xf32>, vector<8x32xf32>, vector<8x8xf32> -> vector<8x8xf32>
    %cst_48 = arith.constant dense<0.000000e+00> : vector<8x8xf32>
    %59 = tpu.matmul %55, %4, %cst_48 {dimension_numbers = #tpu.dot_dimension_numbers<[1], [1], [0], [0], [0, 0, 1, 0], [], []>} : vector<8x32xf32>, vector<8x32xf32>, vector<8x8xf32> -> vector<8x8xf32>
    %60 = arith.addf %58, %59 : vector<8x8xf32>
    %c1 = arith.constant 1 : index
    %c0_49 = arith.constant 0 : index
    %c0_50 = arith.constant 0 : index
    %61 = vector.load %arg9[%c1, %c0_49, %c0_50] : memref<2x8x1xf32, #tpu.memory_space<vmem>>, vector<1x8x1xf32>
    %62 = vector.shape_cast %61 : vector<1x8x1xf32> to vector<8x1xf32>
    %cst_51 = arith.constant dense<0xFF800000> : vector<8xf32>
    %63 = vector.multi_reduction <maximumf>, %60, %cst_51 [1] : vector<8x8xf32> to vector<8xf32>
    %64 = vector.shape_cast %63 : vector<8xf32> to vector<8x1xf32>
    %65 = arith.maximumf %62, %64 : vector<8x1xf32>
    %66 = arith.subf %62, %65 : vector<8x1xf32>
    %67 = math.exp %66 : vector<8x1xf32>
    %68 = vector.broadcast %65 : vector<8x1xf32> to vector<8x8xf32>
    %69 = arith.subf %60, %68 : vector<8x8xf32>
    %70 = math.exp %69 : vector<8x8xf32>
    %c1_52 = arith.constant 1 : index
    %c0_53 = arith.constant 0 : index
    %c0_54 = arith.constant 0 : index
    %71 = vector.load %arg10[%c1_52, %c0_53, %c0_54] : memref<2x8x1xf32, #tpu.memory_space<vmem>>, vector<1x8x1xf32>
    %72 = vector.shape_cast %71 : vector<1x8x1xf32> to vector<8x1xf32>
    %73 = arith.mulf %67, %72 : vector<8x1xf32>
    %cst_55 = arith.constant dense<0.000000e+00> : vector<8xf32>
    %74 = vector.multi_reduction <add>, %70, %cst_55 [1] : vector<8x8xf32> to vector<8xf32>
    %75 = vector.shape_cast %74 : vector<8xf32> to vector<8x1xf32>
    %76 = arith.addf %73, %75 : vector<8x1xf32>
    %c1_56 = arith.constant 1 : index
    %c0_57 = arith.constant 0 : index
    %c0_58 = arith.constant 0 : index
    %77 = vector.load %arg10[%c1_56, %c0_57, %c0_58] : memref<2x8x1xf32, #tpu.memory_space<vmem>>, vector<1x8x1xf32>
    %78 = vector.shape_cast %77 : vector<1x8x1xf32> to vector<8x1xf32>
    %79 = vector.shape_cast %76 : vector<8x1xf32> to vector<1x8x1xf32>
    tpu.vector_store %arg10[%c1_56, %c0_57, %c0_58], %79 {strides = array<i32>} : memref<2x8x1xf32, #tpu.memory_space<vmem>>, vector<1x8x1xf32>,
    %c0_59 = arith.constant 0 : index
    %c0_60 = arith.constant 0 : index
    %c64 = arith.constant 64 : index
    %80 = vector.load %arg7[%c0_59, %c0_60, %c64] : memref<1x8x128xf32, #tpu.memory_space<vmem>>, vector<1x8x64xf32>
    %81 = vector.shape_cast %80 : vector<1x8x64xf32> to vector<8x64xf32>
    %c0_61 = arith.constant 0 : index
    %c64_62 = arith.constant 64 : index
    %82 = vector.load %arg11[%c0_61, %c64_62] : memref<8x128xf32, #tpu.memory_space<vmem>>, vector<8x64xf32>
    %83 = vector.broadcast %67 : vector<8x1xf32> to vector<8x64xf32>
    %84 = arith.mulf %83, %82 : vector<8x64xf32>
    %cst_63 = arith.constant dense<0.000000e+00> : vector<8x64xf32>
    %85 = tpu.matmul %70, %81, %cst_63 {dimension_numbers = #tpu.dot_dimension_numbers<[1], [0], [0], [1], [0, 0, 1, 1], [], []>} : vector<8x8xf32>, vector<8x64xf32>, vector<8x64xf32> -> vector<8x64xf32>
    %86 = arith.addf %84, %85 : vector<8x64xf32>
    %c0_64 = arith.constant 0 : index
    %c64_65 = arith.constant 64 : index
    %87 = vector.load %arg11[%c0_64, %c64_65] : memref<8x128xf32, #tpu.memory_space<vmem>>, vector<8x64xf32>
    tpu.vector_store %arg11[%c0_64, %c64_65], %86 {strides = array<i32>} : memref<8x128xf32, #tpu.memory_space<vmem>>, vector<8x64xf32>,
    %c1_66 = arith.constant 1 : index
    %c0_67 = arith.constant 0 : index
    %c0_68 = arith.constant 0 : index
    %88 = vector.load %arg9[%c1_66, %c0_67, %c0_68] : memref<2x8x1xf32, #tpu.memory_space<vmem>>, vector<1x8x1xf32>
    %89 = vector.shape_cast %88 : vector<1x8x1xf32> to vector<8x1xf32>
    %90 = vector.shape_cast %65 : vector<8x1xf32> to vector<1x8x1xf32>
    tpu.vector_store %arg9[%c1_66, %c0_67, %c0_68], %90 {strides = array<i32>} : memref<2x8x1xf32, #tpu.memory_space<vmem>>, vector<1x8x1xf32>,
    %c0_i32_69 = arith.constant 0 : i32
    %91 = arith.cmpi eq, %arg2, %c0_i32_69 : i32
    %92 = arith.extui %91 : i1 to i32
    %c0_i32_70 = arith.constant 0 : i32
    %93 = arith.cmpi ne, %92, %c0_i32_70 : i32
    scf.if %93 {
      %c0_71 = arith.constant 0 : index
      %c0_72 = arith.constant 0 : index
      %c0_73 = arith.constant 0 : index
      %94 = vector.load %arg10[%c0_71, %c0_72, %c0_73] : memref<2x8x1xf32, #tpu.memory_space<vmem>>, vector<1x8x1xf32>
      %95 = vector.shape_cast %94 : vector<1x8x1xf32> to vector<8x1xf32>
      %96 = tpu.reciprocal %95 : vector<8x1xf32> -> vector<8x1xf32>
      %c0_74 = arith.constant 0 : index
      %c0_75 = arith.constant 0 : index
      %97 = vector.load %arg11[%c0_74, %c0_75] : memref<8x128xf32, #tpu.memory_space<vmem>>, vector<8x64xf32>
      %98 = vector.broadcast %96 : vector<8x1xf32> to vector<8x64xf32>
      %99 = arith.mulf %97, %98 : vector<8x64xf32>
      %c0_76 = arith.constant 0 : index
      %c0_77 = arith.constant 0 : index
      %100 = vector.load %arg11[%c0_76, %c0_77] : memref<8x128xf32, #tpu.memory_space<vmem>>, vector<8x64xf32>
      tpu.vector_store %arg11[%c0_76, %c0_77], %99 {strides = array<i32>} : memref<8x128xf32, #tpu.memory_space<vmem>>, vector<8x64xf32>,
      %c1_78 = arith.constant 1 : index
      %c0_79 = arith.constant 0 : index
      %c0_80 = arith.constant 0 : index
      %101 = vector.load %arg10[%c1_78, %c0_79, %c0_80] : memref<2x8x1xf32, #tpu.memory_space<vmem>>, vector<1x8x1xf32>
      %102 = vector.shape_cast %101 : vector<1x8x1xf32> to vector<8x1xf32>
      %103 = tpu.reciprocal %102 : vector<8x1xf32> -> vector<8x1xf32>
      %c0_81 = arith.constant 0 : index
      %c64_82 = arith.constant 64 : index
      %104 = vector.load %arg11[%c0_81, %c64_82] : memref<8x128xf32, #tpu.memory_space<vmem>>, vector<8x64xf32>
      %105 = vector.broadcast %103 : vector<8x1xf32> to vector<8x64xf32>
      %106 = arith.mulf %104, %105 : vector<8x64xf32>
      %c0_83 = arith.constant 0 : index
      %c64_84 = arith.constant 64 : index
      %107 = vector.load %arg11[%c0_83, %c64_84] : memref<8x128xf32, #tpu.memory_space<vmem>>, vector<8x64xf32>
      tpu.vector_store %arg11[%c0_83, %c64_84], %106 {strides = array<i32>} : memref<8x128xf32, #tpu.memory_space<vmem>>, vector<8x64xf32>,
      %c0_85 = arith.constant 0 : index
      %c0_86 = arith.constant 0 : index
      %108 = vector.load %arg11[%c0_85, %c0_86] : memref<8x128xf32, #tpu.memory_space<vmem>>, vector<8x128xf32>
      %c0_87 = arith.constant 0 : index
      %c0_88 = arith.constant 0 : index
      %c0_89 = arith.constant 0 : index
      %109 = vector.load %arg8[%c0_87, %c0_88, %c0_89] : memref<1x8x128xf32, #tpu.memory_space<vmem>>, vector<1x8x128xf32>
      %110 = vector.shape_cast %109 : vector<1x8x128xf32> to vector<8x128xf32>
      %111 = vector.shape_cast %108 : vector<8x128xf32> to vector<1x8x128xf32>
      tpu.vector_store %arg8[%c0_87, %c0_88, %c0_89], %111 {strides = array<i32>} : memref<1x8x128xf32, #tpu.memory_space<vmem>>, vector<1x8x128xf32>,
    } else {
    }
    return
  }
  func.func @transform_0(%arg0: i32, %arg1: i32, %arg2: i32) -> (i32, i32, i32) {
    %c0_i32 = arith.constant 0 : i32
    %c0_i32_0 = arith.constant 0 : i32
    return %arg0, %arg1, %c0_i32 : i32, i32, i32
  }
  func.func @transform_1(%arg0: i32, %arg1: i32, %arg2: i32) -> (i32, i32, i32) {
    %c0_i32 = arith.constant 0 : i32
    %c0_i32_0 = arith.constant 0 : i32
    return %arg0, %arg1, %c0_i32 : i32, i32, i32
  }
  func.func @transform_2(%arg0: i32, %arg1: i32, %arg2: i32) -> (i32, i32, i32) {
    %c0_i32 = arith.constant 0 : i32
    %c0_i32_0 = arith.constant 0 : i32
    return %arg0, %arg2, %c0_i32 : i32, i32, i32
  }
  func.func @transform_3(%arg0: i32, %arg1: i32, %arg2: i32) -> (i32, i32, i32) {
    %c0_i32 = arith.constant 0 : i32
    %c0_i32_0 = arith.constant 0 : i32
    return %arg0, %arg2, %c0_i32 : i32, i32, i32
  }
  func.func @transform_4(%arg0: i32, %arg1: i32, %arg2: i32) -> (i32, i32, i32) {
    %c0_i32 = arith.constant 0 : i32
    %c0_i32_0 = arith.constant 0 : i32
    return %arg0, %arg2, %c0_i32 : i32, i32, i32
  }
  func.func @transform_5(%arg0: i32, %arg1: i32, %arg2: i32) -> (i32, i32, i32) {
    %c0_i32 = arith.constant 0 : i32
    %c0_i32_0 = arith.constant 0 : i32
    return %arg0, %arg1, %c0_i32 : i32, i32, i32
  }
}

module attributes {stable_mosaic.version = 11 : i64} {
  func.func @_linear_kernel(%arg0: i32, %arg1: i32, %arg2: i32, %arg3: memref<16x128xf32, #tpu.memory_space<vmem>>, %arg4: memref<128x32xf32, #tpu.memory_space<vmem>>, %arg5: memref<16x32xf32, #tpu.memory_space<vmem>>, %arg6: memref<16x32xf32, #tpu.memory_space<vmem>>) attributes {dimension_semantics = [#tpu.dimension_semantics<parallel>, #tpu.dimension_semantics<parallel>, #tpu.dimension_semantics<arbitrary>], iteration_bounds = array<i64: 1, 1, 1>, scalar_prefetch = 0 : i64, scratch_operands = 1 : i64, tpu.core_type = #tpu.core_type<tc>, window_params = [{transform_indices = @transform_0, window_bounds = array<i64: 16, 128>}, {transform_indices = @transform_1, window_bounds = array<i64: 128, 32>}, {transform_indices = @transform_2, window_bounds = array<i64: 16, 32>}]} {
    %c0_i32 = arith.constant 0 : i32
    %0 = arith.cmpi eq, %arg2, %c0_i32 : i32
    %1 = arith.extui %0 : i1 to i32
    %c0_i32_0 = arith.constant 0 : i32
    %2 = arith.cmpi ne, %1, %c0_i32_0 : i32
    scf.if %2 {
      %cst_10 = arith.constant 0.000000e+00 : f32
      %12 = vector.broadcast %cst_10 : f32 to vector<16x32xf32>
      %c0_11 = arith.constant 0 : index
      %c0_12 = arith.constant 0 : index
      %13 = vector.load %arg6[%c0_11, %c0_12] : memref<16x32xf32, #tpu.memory_space<vmem>>, vector<16x32xf32>
      tpu.vector_store %arg6[%c0_11, %c0_12], %12 {strides = array<i32>} : memref<16x32xf32, #tpu.memory_space<vmem>>, vector<16x32xf32>,
    } else {
    }
    %c0 = arith.constant 0 : index
    %c0_1 = arith.constant 0 : index
    %3 = vector.load %arg6[%c0, %c0_1] : memref<16x32xf32, #tpu.memory_space<vmem>>, vector<16x32xf32>
    %c0_2 = arith.constant 0 : index
    %c0_3 = arith.constant 0 : index
    %4 = vector.load %arg3[%c0_2, %c0_3] : memref<16x128xf32, #tpu.memory_space<vmem>>, vector<16x128xf32>
    %c0_4 = arith.constant 0 : index
    %c0_5 = arith.constant 0 : index
    %5 = vector.load %arg4[%c0_4, %c0_5] : memref<128x32xf32, #tpu.memory_space<vmem>>, vector<128x32xf32>
    %cst = arith.constant dense<0.000000e+00> : vector<16x32xf32>
    %6 = tpu.matmul %4, %5, %cst {dimension_numbers = #tpu.dot_dimension_numbers<[1], [0], [0], [1], [0, 0, 1, 1], [], []>} : vector<16x128xf32>, vector<128x32xf32>, vector<16x32xf32> -> vector<16x32xf32>
    %7 = arith.addf %3, %6 : vector<16x32xf32>
    %c0_6 = arith.constant 0 : index
    %c0_7 = arith.constant 0 : index
    %8 = vector.load %arg6[%c0_6, %c0_7] : memref<16x32xf32, #tpu.memory_space<vmem>>, vector<16x32xf32>
    tpu.vector_store %arg6[%c0_6, %c0_7], %7 {strides = array<i32>} : memref<16x32xf32, #tpu.memory_space<vmem>>, vector<16x32xf32>,
    %c0_i32_8 = arith.constant 0 : i32
    %9 = arith.cmpi eq, %arg2, %c0_i32_8 : i32
    %10 = arith.extui %9 : i1 to i32
    %c0_i32_9 = arith.constant 0 : i32
    %11 = arith.cmpi ne, %10, %c0_i32_9 : i32
    scf.if %11 {
      %c0_10 = arith.constant 0 : index
      %c0_11 = arith.constant 0 : index
      %12 = vector.load %arg6[%c0_10, %c0_11] : memref<16x32xf32, #tpu.memory_space<vmem>>, vector<16x32xf32>
      %c0_12 = arith.constant 0 : index
      %c0_13 = arith.constant 0 : index
      %13 = vector.load %arg5[%c0_12, %c0_13] : memref<16x32xf32, #tpu.memory_space<vmem>>, vector<16x32xf32>
      tpu.vector_store %arg5[%c0_12, %c0_13], %12 {strides = array<i32>} : memref<16x32xf32, #tpu.memory_space<vmem>>, vector<16x32xf32>,
    } else {
    }
    return
  }
  func.func @transform_0(%arg0: i32, %arg1: i32, %arg2: i32) -> (i32, i32) {
    %c0_i32 = arith.constant 0 : i32
    return %arg0, %arg2 : i32, i32
  }
  func.func @transform_1(%arg0: i32, %arg1: i32, %arg2: i32) -> (i32, i32) {
    %c0_i32 = arith.constant 0 : i32
    return %arg2, %arg1 : i32, i32
  }
  func.func @transform_2(%arg0: i32, %arg1: i32, %arg2: i32) -> (i32, i32) {
    %c0_i32 = arith.constant 0 : i32
    return %arg0, %arg1 : i32, i32
  }
}

</mosaic_0001>

<bundles_post_ra>
// kernel: custom-call.1
= control target key start
LH: loop header
LB: loop body
LE: loop exit
PB: predicated region body
PF: predicated region fallthrough
CT: control target
= control target key end

     0   :  { %s51_s0 = inlined_call_operand.hbm [shape: c64[16,16], index: 0, kind: input, shape index: {}]   ;;  %s52_s1 = inlined_call_operand.vmem [shape: f32[16,16], index: 1, kind: output, shape index: {}]  }
   0x1   :  { %s2_s8 = scalar_lea.hbm %s51_s0, 256 }
   0x2   :  { %3 = vsyncpa [#allocation0], 0  ;;  %s4_s11 = sshll.u32 %s52_s1, 4  ;;  %s5_s11 = int_to_ptr.vmem [resolvable:$true] %s4_s11 }
   0x3   :  { %s20_s12 = scalar_lea.vmem %s5_s11, 256  ;;  %p25_p1 = scmp.lt.s32.totalorder %s5_s11, %s5_s11 }
   0x4   :  { %p21_p0 = scmp.ne.s32.totalorder %s5_s11, %s20_s12  ;;  %p26_p2 = scmp.lt.s32.totalorder %s20_s12, %s20_s12 }
   0x6   :  { %p27_p3 = por %p26_p2, %p25_p1 }
   0x8   :  { %p28_p4 = pnand %p27_p3, %p21_p0 }
   0xa   :  { %31 = shalt.err (!%p28_p4)  }
   0xb   :  { %7 = dma.hbm_to_vmem [thread:$0]  %s2_s8, 256, %s5_s11, [#allocation0] }
   0xc   :  { %33 = dma.done.wait [#allocation0], 256  }
   0xd   :  { %34 = vsyncadd [#allocation0], 4294967040 }
   0xe   :  { %9 = vsyncpa [#allocation0], 1 }

// kernel: custom-call
= control target key start
LH: loop header
LB: loop body
LE: loop exit
PB: predicated region body
PF: predicated region fallthrough
CT: control target
= control target key end

     0   :  { %2 = vsyncpa [#allocation0], 0  ;;  %s47_s0 = inlined_call_operand.hbm [shape: c64[16,16], index: 0, kind: input, shape index: {}]   ;;  %s48_s1 = inlined_call_operand.vmem [shape: f32[16,16], index: 1, kind: output, shape index: {}]  }
   0x1   :  { %s3_s8 = sshll.u32 %s48_s1, 4  ;;  %s4_s8 = int_to_ptr.vmem [resolvable:$true] %s3_s8 }
   0x2   :  { %s17_s9 = scalar_lea.vmem %s4_s8, 256  ;;  %p22_p1 = scmp.lt.s32.totalorder %s4_s8, %s4_s8 }
   0x3   :  { %p18_p0 = scmp.ne.s32.totalorder %s4_s8, %s17_s9  ;;  %p23_p2 = scmp.lt.s32.totalorder %s17_s9, %s17_s9 }
   0x5   :  { %p24_p3 = por %p23_p2, %p22_p1 }
   0x7   :  { %p25_p4 = pnand %p24_p3, %p18_p0 }
   0x9   :  { %28 = shalt.err (!%p25_p4)  }
   0xa   :  { %6 = dma.hbm_to_vmem [thread:$0]  %s47_s0, 256, %s4_s8, [#allocation0] }
   0xb   :  { %29 = dma.done.wait [#allocation0], 256  }
   0xc   :  { %30 = vsyncadd [#allocation0], 4294967040 }
   0xd   :  { %8 = vsyncpa [#allocation0], 1 }

// kernel: run_f32.4
= control target key start
LH: loop header
LB: loop body
LE: loop exit
PB: predicated region body
PF: predicated region fallthrough
CT: control target
= control target key end

     0   :  { %v153_v3 = vmov 0.0   ;;  %vm34_vm0 = vcmask 261120   ;;  %vm16_vm1 = vcmask 523264   ;;  %s217_s1 = inlined_call_operand.vmem [shape: f32[32,192], index: 1, kind: input, shape index: {}]   ;;  %s218_s0 = inlined_call_operand.vmem [shape: f32[16,32], index: 0, kind: input, shape index: {}]   ;;  %s219_s2 = inlined_call_operand.vmem [shape: f32[16,192], index: 2, kind: output, shape index: {}]  }
   0x1   :  { %v33_v0 = vld [vmem:[%s217_s1 + $0x38] sm:$0xff]  ;;  %v32_v1 = vld [vmem:[%s217_s1 + $0x30] sm:$0xff]  ;;  %v31_v2 = vld [vmem:[%s217_s1 + $0x28] sm:$0xff]  ;;  %105 = vmatprep.mubr.f32.mxu0 %v153_v3  ;;  %111 = vmatprep.mubr.f32.mxu1 %v153_v3  ;;  %17 = vst.msk [vmem:[#allocation2 + $0x8] sm:$0xff] %vm16_vm1, %v153_v3 }
   0x2   :  { %65 = vmatprep.subr.mxu0 %v33_v0  ;;  %144 = vmatprep.subr.mxu1 %v33_v0  ;;  %v30_v4 = vld [vmem:[%s217_s1 + $0x20] sm:$0xff]  ;;  %v29_v5 = vld [vmem:[%s217_s1 + $0x18] sm:$0xff]  ;;  %v28_v6 = vld [vmem:[%s217_s1 + $0x10] sm:$0xff]  ;;  %19 = vst.msk [vmem:[#allocation2 + $0x18] sm:$0xff] %vm16_vm1, %v153_v3 }
   0x3   :  { %66 = vmatpush1.msra.mxu0 %v32_v1  ;;  %148 = vmatpush1.msra.mxu1 %v32_v1  ;;  %v27_v7 = vld [vmem:[%s217_s1 + $0x8] sm:$0xff]  ;;  %v26_v8 = vld [vmem:[%s217_s1] sm:$0xff] }
   0x4   :  { %67 = vmatprep.subr.mxu0 %v31_v2  ;;  %145 = vmatprep.subr.mxu1 %v31_v2  ;;  %v24_v9 = vld [vmem:[%s218_s0] sm:$0xff]  ;;  %v25_v10 = vld [vmem:[%s218_s0 + $0x8] sm:$0xff] }
   0x5   :  { %68 = vmatpush1.msra.mxu0 %v30_v4  ;;  %149 = vmatpush1.msra.mxu1 %v30_v4 }
   0x6   :  { %69 = vmatprep.subr.mxu0 %v29_v5  ;;  %146 = vmatprep.subr.mxu1 %v29_v5 }
   0x7   :  { %70 = vmatpush1.msra.mxu0 %v28_v6  ;;  %150 = vmatpush1.msra.mxu1 %v28_v6 }
   0x8   :  { %71 = vmatprep.subr.mxu0 %v27_v7  ;;  %147 = vmatprep.subr.mxu1 %v27_v7  ;;  %v21_v13 = vld [vmem:[#allocation2 + $0x8] sm:$0xff] }
   0x9   :  { %72 = vmatpush1.msra.mxu0 %v26_v8  ;;  %151 = vmatpush1.msra.mxu1 %v26_v8  ;;  %v23_v14 = vld [vmem:[#allocation2 + $0x18] sm:$0xff] }
   0xa   :  { %142 = vmatmul.mubr.msk.f32.vlgmr.msra.gmra.mxu0 %vm34_vm0, %v24_v9  ;;  %143 = vmatmul.mubr.msk.f32.vlgmr.msra.gmra.mxu1 %vm34_vm0, %v25_v10 }
  0xca   :  { %v107_v11 = vpop.f32.mrf.mxu0  ;;  %v113_v12 = vpop.f32.mrf.mxu1 }
  0xcb   :  { %134 = vst [vmem:[%s219_s2] sm:$0xff] %v107_v11  ;;  %136 = vst [vmem:[%s219_s2 + $0x10] sm:$0xff] %v113_v12 }
  0xcc   :  { %v109_v15 = vpop.f32.mrf.mxu0  ;;  %v115_v16 = vpop.f32.mrf.mxu1 }
  0xcd   :  { %v119_v17 = vadd.f32 %v109_v15, %v21_v13  ;;  %v121_v18 = vadd.f32 %v115_v16, %v23_v14 }
  0xcf   :  { %124 = vst.msk [vmem:[#allocation2 + $0x8] sm:$0xff] %vm16_vm1, %v119_v17  ;;  %126 = vst.msk [vmem:[#allocation2 + $0x18] sm:$0xff] %vm16_vm1, %v121_v18 }
  0xd6   :  { %v131_v19 = vld [vmem:[#allocation2 + $0x8] sm:$0xff]  ;;  %v133_v20 = vld [vmem:[#allocation2 + $0x18] sm:$0xff] }
  0xd7   :  { %135 = vst.msk [vmem:[%s219_s2 + $0x8] sm:$0xff] %vm16_vm1, %v131_v19  ;;  %137 = vst.msk [vmem:[%s219_s2 + $0x18] sm:$0xff] %vm16_vm1, %v133_v20 }

// kernel: run_f32.7
= control target key start
LH: loop header
LB: loop body
LE: loop exit
PB: predicated region body
PF: predicated region fallthrough
CT: control target
= control target key end

     0   :  { %vm16_vm0 = vcmask 261120   ;;  %v221_v2 = vmov 0.0   ;;  %s303_s0 = inlined_call_operand.vmem [shape: f32[16,128], index: 0, kind: input, shape index: {}]   ;;  %s304_s1 = inlined_call_operand.vmem [shape: f32[128,32], index: 1, kind: input, shape index: {}]   ;;  %s305_s2 = inlined_call_operand.hbm [shape: f32[16,32], index: 2, kind: output, shape index: {}]  }
   0x1   :  { %v38_v0 = vld [vmem:[%s304_s1 + $0x78] sm:$0xff]  ;;  %v37_v1 = vld [vmem:[%s304_s1 + $0x70] sm:$0xff]  ;;  %18 = vst.msk [vmem:[#allocation2 + $0x8] sm:$0xff] %vm16_vm0, %v221_v2  ;;  %17 = vst.msk [vmem:[#allocation2] sm:$0xff] %vm16_vm0, %v221_v2 }
   0x2   :  { %160 = vmatprep.subr.mxu0 %v38_v0  ;;  %v36_v3 = vld [vmem:[%s304_s1 + $0x68] sm:$0xff]  ;;  %v35_v4 = vld [vmem:[%s304_s1 + $0x60] sm:$0xff]  ;;  %v34_v6 = vld [vmem:[%s304_s1 + $0x58] sm:$0xff] }
   0x3   :  { %161 = vmatpush3.msra.mxu0 %v38_v0  ;;  %v21_v5 = vld [vmem:[%s303_s0] sm:$0xff] }
   0x4   :  { %162 = vmatprep.subr.mxu0 %v37_v1  ;;  %192 = vmatprep.mubr.f32.mxu0 %v21_v5 }
   0x5   :  { %163 = vmatpush3.msra.mxu0 %v37_v1 }
   0x6   :  { %164 = vmatprep.subr.mxu0 %v36_v3 }
   0x7   :  { %165 = vmatpush3.msra.mxu0 %v36_v3 }
   0x8   :  { %7 = vsyncpa [#allocation4], 0  ;;  %166 = vmatprep.subr.mxu0 %v35_v4  ;;  %v33_v7 = vld [vmem:[%s304_s1 + $0x50] sm:$0xff]  ;;  %v32_v8 = vld [vmem:[%s304_s1 + $0x48] sm:$0xff] }
   0x9   :  { %167 = vmatpush3.msra.mxu0 %v35_v4  ;;  %v31_v9 = vld [vmem:[%s304_s1 + $0x40] sm:$0xff]  ;;  %v30_v10 = vld [vmem:[%s304_s1 + $0x38] sm:$0xff]  ;;  %v29_v11 = vld [vmem:[%s304_s1 + $0x30] sm:$0xff] }
   0xa   :  { %168 = vmatprep.subr.mxu0 %v34_v6  ;;  %v28_v12 = vld [vmem:[%s304_s1 + $0x28] sm:$0xff]  ;;  %v27_v13 = vld [vmem:[%s304_s1 + $0x20] sm:$0xff]  ;;  %v26_v14 = vld [vmem:[%s304_s1 + $0x18] sm:$0xff] }
   0xb   :  { %169 = vmatpush3.msra.mxu0 %v34_v6  ;;  %v25_v15 = vld [vmem:[%s304_s1 + $0x10] sm:$0xff]  ;;  %v24_v16 = vld [vmem:[%s304_s1 + $0x8] sm:$0xff]  ;;  %v23_v17 = vld [vmem:[%s304_s1] sm:$0xff]  ;;  %s222_s1 = smov [#allocation3]  }
   0xc   :  { %170 = vmatprep.subr.mxu0 %v33_v7  ;;  %v22_v18 = vld [vmem:[%s303_s0 + $0x8] sm:$0xff]  ;;  %v19_v21 = vld [vmem:[#allocation2] sm:$0xff]  ;;  %s131_s17 = sshll.u32 %s222_s1, 4  ;;  %s132_s17 = int_to_ptr.vmem [resolvable:$true] %s131_s17 }
   0xd   :  { %171 = vmatpush3.msra.mxu0 %v33_v7  ;;  %v20_v19 = vld [vmem:[#allocation2 + $0x8] sm:$0xff]  ;;  %s199_s0 = scalar_lea.vmem %s132_s17, 256  ;;  %p204_p1 = scmp.lt.s32.totalorder %s132_s17, %s132_s17 }
   0xe   :  { %172 = vmatprep.subr.mxu0 %v32_v8  ;;  %p200_p0 = scmp.ne.s32.totalorder %s132_s17, %s199_s0  ;;  %p205_p2 = scmp.lt.s32.totalorder %s199_s0, %s199_s0 }
   0xf   :  { %173 = vmatpush3.msra.mxu0 %v32_v8 }
  0x10   :  { %174 = vmatprep.subr.mxu0 %v31_v9  ;;  %p206_p3 = por %p205_p2, %p204_p1 }
  0x11   :  { %175 = vmatpush3.msra.mxu0 %v31_v9 }
  0x12   :  { %176 = vmatprep.subr.mxu0 %v30_v10  ;;  %p207_p4 = pnand %p206_p3, %p200_p0 }
  0x13   :  { %177 = vmatpush3.msra.mxu0 %v30_v10 }
  0x14   :  { %178 = vmatprep.subr.mxu0 %v29_v11 }
  0x15   :  { %179 = vmatpush3.msra.mxu0 %v29_v11 }
  0x16   :  { %180 = vmatprep.subr.mxu0 %v28_v12 }
  0x17   :  { %181 = vmatpush3.msra.mxu0 %v28_v12 }
  0x18   :  { %182 = vmatprep.subr.mxu0 %v27_v13 }
  0x19   :  { %183 = vmatpush3.msra.mxu0 %v27_v13 }
  0x1a   :  { %184 = vmatprep.subr.mxu0 %v26_v14 }
  0x1b   :  { %185 = vmatpush3.msra.mxu0 %v26_v14 }
  0x1c   :  { %186 = vmatprep.subr.mxu0 %v25_v15 }
  0x1d   :  { %187 = vmatpush3.msra.mxu0 %v25_v15 }
  0x1e   :  { %188 = vmatprep.subr.mxu0 %v24_v16 }
  0x1f   :  { %189 = vmatpush3.msra.mxu0 %v24_v16 }
  0x20   :  { %190 = vmatprep.subr.mxu0 %v23_v17 }
  0x21   :  { %191 = vmatpush3.msra.mxu0 %v23_v17 }
  0x22   :  { %193 = vmatmul.mubr.f32.vlgmr.msra.gmra.mxu0 %v22_v18 }
  0xe2   :  { %v194_v20 = vpop.f32.mrf.mxu0 }
  0xe3   :  { %v115_v22 = vadd.f32 %v194_v20, %v20_v19 }
  0xe4   :  { %v105_v23 = vpop.f32.mrf.mxu0 }
  0xe5   :  { %118 = vst.msk [vmem:[#allocation2 + $0x8] sm:$0xff] %vm16_vm0, %v115_v22  ;;  %v114_v24 = vadd.f32 %v105_v23, %v19_v21 }
  0xe7   :  { %117 = vst.msk [vmem:[#allocation2] sm:$0xff] %vm16_vm0, %v114_v24 }
  0xec   :  { %v123_v25 = vld [vmem:[#allocation2 + $0x8] sm:$0xff] }
  0xed   :  { %125 = vst.msk [vmem:[#allocation3 + $0x8] sm:$0xff] %vm16_vm0, %v123_v25 }
  0xee   :  { %v122_v26 = vld [vmem:[#allocation2] sm:$0xff] }
  0xef   :  { %124 = vst.msk [vmem:[#allocation3] sm:$0xff] %vm16_vm0, %v122_v26 }
  0xf0   :  { %210 = shalt.err (!%p207_p4)
}
  0xf1   :  { %s223_s18 = smov 128   ;;  %s224_s19 = smov 8  }
  0xf2   :  { %137 = dma.vmem_to_hbm [thread:$0]  %s132_s17, 256, %s305_s2, [#allocation4], %s223_s18, %s223_s18, %s224_s19  }
  0xf3   :  { %219 = dma.done.wait [#allocation4], 256  }
  0xf4   :  { %220 = vsyncadd [#allocation4], 4294967040 }
  0xf5   :  { %141 = vsyncpa [#allocation4], 1 }

// kernel: run_f32.6
= control target key start
LH: loop header
LB: loop body
LE: loop exit
PB: predicated region body
PF: predicated region fallthrough
CT: control target
= control target key end

     0   :  { %s1258_s18 = smov 0   ;;  %s1260_s19 = smov 0   ;;  %s1358_s0 = inlined_call_operand.vmem [shape: f32[2,8,64], index: 0, kind: input, shape index: {}]   ;;  %s1359_s1 = inlined_call_operand.vmem [shape: f32[2,8,64], index: 1, kind: input, shape index: {}]   ;;  %s1360_s2 = inlined_call_operand.vmem [shape: f32[2,8,64], index: 2, kind: input, shape index: {}]   ;;  %s1361_s3 = inlined_call_operand.vmem [shape: f32[2,8,32], index: 3, kind: input, shape index: {}]   ;;  %s1362_s4 = inlined_call_operand.vmem [shape: f32[2,8,128], index: 4, kind: input, shape index: {}]   ;;  %s1363_s5 = inlined_call_operand.vmem [shape: f32[2,8,128], index: 5, kind: output, shape index: {}]  }
   0x1   :  { %s1262_s20 = smov 0  }
   0x2 LB: > { %s34_s21 = sadd.s32 1, %s1216_s19  ;;  %p1093_p0 = scmp.ge.s32.totalorder %s1220_s20, 1  ;;  %s1220_s20 = sphi %s1262_s20, %s15_s20   ;;  %s1216_s19 = sphi %s1260_s19, %s1365_s19   ;;  %s1212_s18 = sphi %s1258_s18, %s1364_s18  }
   0x3   : > { %p36_p1 = scmp.ge.s32.totalorder %s34_s21, 2  ;;  %p268_p2 = scmp.lt.s32.totalorder %s1220_s20, 3 }
   0x5   : > { %s1367_s21 = smov (%p36_p1, %s34_s21), 0  ;;  %p269_p3 = pnand %p1093_p0, %p268_p2 }
   0x6   : > { %p328_p4 = scmp.lt.s32.totalorder (!%p269_p3), %s1212_s18, 1  ;;  %s1226_s10 = smov (!%p269_p3), 96  }
   0x7   : > { %272 = sbr.rel (%p269_p3) target bundleno = 1323 (0x52b), region = 40  ;;  %s1227_s14 = smov (!%p269_p3), 64  }
   0xc   : > { %v1222_v0 = vmov 0.0   ;;  %s1369_s18 = smov (!%p328_p4, %s1212_s18), 1  ;;  %vm1223_vm0 = vmmov 0   ;;  %vm386_vm1 = vcmask 261120   ;;  %vm374_vm2 = vcmask 7168  }
   0xd   : > { %1124 = vmatprep.subr.mxu0 %v1222_v0  ;;  %379 = vst [vmem:[#allocation4] sm:$0xff] %v1222_v0  ;;  %1129 = vmatprep.subr.mxu1 %v1222_v0  ;;  %s1283_s22 = sshll.u32 %s1369_s18, 3  ;;  %v1224_v7 = vmov -inf   ;;  %377 = vst.msk [vmem:[#allocation3] sm:$0xff] %vm374_vm2, %v1222_v0  ;;  %vm540_vm3 = vcmask 64512   ;;  %v1225_v14 = vmov 0  }
   0xe   : > { %1126 = vmatprep.mubr.msk.f32.mxu0 %vm1223_vm0, %v1222_v0  ;;  %1131 = vmatprep.mubr.msk.f32.mxu1 %vm1223_vm0, %v1222_v0  ;;  %s355_s25 = scalar_lea.vmem %s1361_s3, %s1283_s22  ;;  %s348_s28 = scalar_lea.vmem %s1360_s2, %s1283_s22  ;;  %375 = vst.msk [vmem:[#allocation2] sm:$0xff] %vm374_vm2, %v1224_v7  ;;  %376 = vst.msk [vmem:[#allocation2 + $0x8] sm:$0xff] %vm374_vm2, %v1224_v7  ;;  %vm646_vm4 = vcmask 523264   ;;  %vm924_vm5 = vcmask 1048064  }
   0xf   : > { %v380_v1 = vld [vmem:[%s355_s25] sm:$0xff]  ;;  %s341_s6 = scalar_lea.vmem %s1359_s1, %s1283_s22  ;;  %s334_s9 = scalar_lea.vmem %s1358_s0, %s1283_s22  ;;  %378 = vst.msk [vmem:[#allocation3 + $0x8] sm:$0xff] %vm374_vm2, %v1222_v0  ;;  %1184 = vset.pattern.permute.xlu0 %v1225_v14  ;;  %1185 = vset.pattern.permute.xlu1 %v1225_v14 }
  0x10   : > { %1125 = vmatpush3.xpose.msk.msra.mxu0 %vm386_vm1, %v380_v1  ;;  %v385_v2 = vld [vmem:[%s348_s28] sm:$0xff]  ;;  %s362_s13 = scalar_lea.vmem %s1362_s4, %s1283_s22  ;;  %s369_s17 = scalar_lea.vmem %s1363_s5, %s1283_s22 }
  0x11   : > { %v383_v3 = vld [vmem:[%s341_s6] sm:$0xff]  ;;  %1130 = vmatpush3.xpose.msk.msra.mxu1 %vm386_vm1, %v385_v2  ;;  %1134 = vmatprep.subr.mxu0 %v1222_v0 }
  0x12   : > { %v384_v4 = vmul.f32 0.125, %v383_v3  ;;  %v381_v5 = vld [vmem:[%s334_s9] sm:$0xff]  ;;  %1139 = vmatprep.subr.mxu1 %v1222_v0  ;;  %733 = vrot.lane.b32.xlu1 %v385_v2, %s1226_s10 }
  0x13   : > { %v382_v6 = vmul.f32 0.125, %v381_v5  ;;  %v564_v20 = vld [vmem:[%s362_s13] sm:$0xff] }
  0x14   : > { %1127 = vmatmul.mubr.msk.f32.vlgmr.msra.gmra.mxu0 %vm386_vm1, %v384_v4  ;;  %v556_v50 = vld [vmem:[#allocation3] sm:$0xff] }
  0x15   : > { %1132 = vmatmul.mubr.msk.f32.vlgmr.msra.gmra.mxu1 %vm386_vm1, %v382_v6  ;;  %1136 = vmatprep.mubr.msk.f32.mxu0 %vm1223_vm0, %v1222_v0  ;;  %v539_v15 = vld [vmem:[#allocation2] sm:$0xff]  ;;  %v810_v35 = vld [vmem:[#allocation2 + $0x8] sm:$0xff] }
  0x16   : > { %1140 = vmatpush3.xpose.msk.msra.mxu1 %vm386_vm1, %v380_v1  ;;  %1141 = vmatprep.mubr.msk.f32.mxu1 %vm1223_vm0, %v1222_v0  ;;  %v827_v57 = vld [vmem:[#allocation3 + $0x8] sm:$0xff] }
  0x17   : > { %1149 = vmatprep.subr.mxu1 %v1222_v0  ;;  %655 = vrot.lane.b32.xlu1 %v384_v4, %s1226_s10 }
  0x18   : > { %1135 = vmatpush3.msra.mxu0 %v564_v20 }
  0x19   : > { %1144 = vmatprep.subr.mxu0 %v1222_v0 }
  0x1b   : > { %730 = vrot.lane.b32.xlu1 %v382_v6, %s1226_s10 }
  0x84   : > { %v734_v19 = vpop.permute.xlu1 %733 }
  0x89   : > { %v656_v21 = vpop.permute.xlu1 %655 }
  0x8a   : > { %1142 = vmatmul.mubr.msk.f32.vlgmr.msra.gmra.mxu1 %vm386_vm1, %v656_v21 }
  0x8b   : > { %1151 = vmatprep.mubr.msk.f32.mxu1 %vm1223_vm0, %v1222_v0 }
  0x8d   : > { %v731_v26 = vpop.permute.xlu1 %730 }
  0xd4   : > { %v459_v8 = vpop.f32.mrf.mxu0 }
  0xd5   : > { %v535_v9 = vpop.f32.mrf.mxu1 }
  0xd6   : > { %v536_v10 = vadd.f32 %v535_v9, %v459_v8  ;;  %v1128_v11 = vpop.f32.mrf.mxu0 }
  0xd7   : > { %v1133_v12 = vpop.f32.mrf.mxu1 }
  0xd8   : > { %v541_v13 = vsel %vm540_vm3, %v536_v10, -inf }
  0xd9   : > { %542 = vmax.xlane.f32.xlu0 %v541_v13 }
 0x14a   : > { %v725_v27 = vpop.f32.mrf.mxu1 }
 0x14c   : > { %v1143_v28 = vpop.f32.mrf.mxu1 }
 0x162   : > { %v543_v16 = vpop.xlane.xlu0 %542 }
 0x163   : > { %v544_v17 = vmax.f32 %v539_v15, %v543_v16 }
 0x165   : > { %v545_v18 = vsub.f32 %v539_v15, %v544_v17  ;;  %648 = vst.msk [vmem:[#allocation2] sm:$0xff] %vm374_vm2, %v544_v17  ;;  %550 = vperm.xlu0 %1184, %v544_v17  }
 0x167   : > { %v546_v41 = vmul.f32 1.442695, %v545_v18 }
 0x1e0   : > { %v551_v22 = vpop.permute.xlu0 %550 }
 0x1e1   : > { %v553_v23 = vsub.f32 %v536_v10, %v551_v22 }
 0x1e3   : > { %v554_v24 = vmul.f32 1.442695, %v553_v23 }
 0x1e5   : > { %1186 = vpow2.f32 %v554_v24 }
 0x1e6   : > { %1188 = vpow2.f32 %v546_v41 }
 0x1f2   : > { %v1187_v25 = vpop.eup %1186 }
 0x1f3   : > { %1137 = vmatmul.mubr.msk.f32.vlgmr.msra.gmra.mxu0 %vm540_vm3, %v1187_v25  ;;  %v558_v40 = vsel %vm540_vm3, %v1187_v25, 0.0  ;;  %v1189_v42 = vpop.eup %1188 }
 0x1f4   : > { %1145 = vmatpush3.xpose.msk.msra.mxu0 %vm386_vm1, %v734_v19  ;;  %1146 = vmatprep.mubr.msk.f32.mxu0 %vm1223_vm0, %v1222_v0  ;;  %v557_v51 = vmul.f32 %v1189_v42, %v556_v50 }
 0x1f7   : > { %1147 = vmatmul.mubr.msk.f32.vlgmr.msra.gmra.mxu0 %vm386_vm1, %v731_v26 }
 0x2b3   : > { %v641_v29 = vpop.f32.mrf.mxu0 }
 0x2b5   : > { %v1138_v30 = vpop.f32.mrf.mxu0 }
 0x2b7   : > { %v805_v31 = vpop.f32.mrf.mxu0 }
 0x2b8   : > { %v806_v32 = vadd.f32 %v805_v31, %v725_v27 }
 0x2b9   : > { %v1148_v33 = vpop.f32.mrf.mxu0 }
 0x2ba   : > { %v811_v34 = vsel %vm540_vm3, %v806_v32, -inf }
 0x2bb   : > { %812 = vmax.xlane.f32.xlu1 %v811_v34 }
 0x2cc   : > { %843 = vrot.lane.b32.xlu1 %v564_v20, %s1227_s14 }
 0x344   : > { %v813_v36 = vpop.xlane.xlu1 %812 }
 0x345   : > { %v814_v37 = vmax.f32 %v810_v35, %v813_v36 }
 0x347   : > { %v815_v38 = vsub.f32 %v810_v35, %v814_v37  ;;  %926 = vst.msk [vmem:[#allocation2 + $0x8] sm:$0xff] %vm374_vm2, %v814_v37  ;;  %820 = vperm.xlu0 %1184, %v814_v37  }
 0x348   : > { %v844_v39 = vpop.permute.xlu1 %843 }
 0x349   : > { %1150 = vmatpush3.msra.mxu1 %v844_v39  ;;  %v816_v47 = vmul.f32 1.442695, %v815_v38 }
 0x366   : > { %559 = vadd.xlane.f32.xlu0 %v558_v40 }
 0x37c   : > { %568 = vperm.xlu0 %1184, %v1189_v42  }
 0x3c2   : > { %v821_v43 = vpop.permute.xlu0 %820 }
 0x3c3   : > { %v823_v44 = vsub.f32 %v806_v32, %v821_v43 }
 0x3c5   : > { %v824_v45 = vmul.f32 1.442695, %v823_v44 }
 0x3c7   : > { %1190 = vpow2.f32 %v824_v45 }
 0x3c8   : > { %1192 = vpow2.f32 %v816_v47 }
 0x3d4   : > { %v1191_v46 = vpop.eup %1190 }
 0x3d5   : > { %1152 = vmatmul.mubr.msk.f32.vlgmr.msra.gmra.mxu1 %vm540_vm3, %v1191_v46  ;;  %v829_v48 = vsel %vm540_vm3, %v1191_v46, 0.0  ;;  %v1193_v49 = vpop.eup %1192 }
 0x3d6   : > { %830 = vadd.xlane.f32.xlu1 %v829_v48  ;;  %v828_v58 = vmul.f32 %v1193_v49, %v827_v57 }
 0x3e7   : > { %838 = vperm.xlu1 %1185, %v1193_v49  }
 0x3ef   : > { %v560_v52 = vpop.xlane.xlu0 %559 }
 0x3f0   : > { %v561_v53 = vadd.f32 %v560_v52, %v557_v51 }
 0x3f2   : > { %563 = vst.msk [vmem:[#allocation3] sm:$0xff] %vm374_vm2, %v561_v53 }
 0x3f7   : > { %v569_v54 = vpop.permute.xlu0 %568 }
 0x3f8   : > { %v571_v55 = vmul.f32 0.0, %v569_v54 }
 0x3f9   : > { %v930_v61 = vld [vmem:[#allocation3] sm:$0xff] }
 0x3fa   : > { %v645_v56 = vadd.f32 %v641_v29, %v571_v55  ;;  %1194 = vrcp.f32 %v930_v61 }
 0x3fc   : > { %647 = vst.msk [vmem:[#allocation4] sm:$0xff] %vm646_vm4, %v645_v56 }
 0x403   : > { %v835_v4 = vld [vmem:[#allocation4] sm:$0xff] }
 0x407   : > { %v1195_v1 = vpop.eup %1194 }
 0x45f   : > { %v831_v59 = vpop.xlane.xlu1 %830 }
 0x460   : > { %v832_v60 = vadd.f32 %v831_v59, %v828_v58 }
 0x462   : > { %833 = vst.msk [vmem:[#allocation3 + $0x8] sm:$0xff] %vm374_vm2, %v832_v60 }
 0x463   : > { %v839_v3 = vpop.permute.xlu1 %838 }
 0x464   : > { %v841_v5 = vmul.f32 %v839_v3, %v835_v4 }
 0x469   : > { %v940_v62 = vld [vmem:[#allocation3 + $0x8] sm:$0xff] }
 0x46a   : > { %1196 = vrcp.f32 %v940_v62 }
 0x477   : > { %v1197_v2 = vpop.eup %1196 }
 0x495   : > { %v915_v63 = vpop.f32.mrf.mxu1 }
 0x496   : > { %920 = vrot.lane.b32.xlu0 %v915_v63, %s1227_s14 }
 0x497   : > { %v1153_v0 = vpop.f32.mrf.mxu1 }
 0x49a   : > { %935 = vperm.xlu0 %1184, %v1195_v1  }
 0x49e   : > { %945 = vperm.xlu0 %1184, %v1197_v2  }
 0x508   : > { %v921_v6 = vpop.permute.xlu0 %920 }
 0x509   : > { %v923_v7 = vadd.f32 %v921_v6, %v841_v5 }
 0x50b   : > { %925 = vst.msk [vmem:[#allocation4] sm:$0xff] %vm924_vm5, %v923_v7 }
 0x512   : > { %v932_v8 = vld [vmem:[#allocation4] sm:$0xff] }
 0x515   : > { %v936_v9 = vpop.permute.xlu0 %935 }
 0x516   : > { %v938_v10 = vmul.f32 %v936_v9, %v932_v8 }
 0x518   : > { %939 = vst.msk [vmem:[#allocation4] sm:$0xff] %vm646_vm4, %v938_v10 }
 0x519   : > { %v946_v12 = vpop.permute.xlu0 %945 }
 0x51f   : > { %v942_v11 = vld [vmem:[#allocation4] sm:$0xff] }
 0x520   : > { %v948_v13 = vmul.f32 %v946_v12, %v942_v11 }
 0x522   : > { %949 = vst.msk [vmem:[#allocation4] sm:$0xff] %vm924_vm5, %v948_v13 }
 0x529   : > { %v950_v14 = vld [vmem:[#allocation4] sm:$0xff] }
 0x52a   : > { %951 = vst [vmem:[%s369_s17] sm:$0xff] %v950_v14 }
 0x52b PF: > { %s15_s20 = sadd.s32 1, %s1220_s20   ;;  %s1364_s18 = smov %s1216_s19 }
 0x52c   : > { %p12_p5 = scmp.ge.s32.totalorder %s15_s20, 4   ;;  %s1365_s19 = smov %s1367_s21 }
 0x52e   :  { %14 = sbr.rel (!%p12_p5) target bundleno = 2 (0x2), region = 92 }

</bundles_post_ra>
